<compile_context>
chip_gen: v7x
topology: tpu7x:2x2x1
jax: 0.10.0
libtpu: 0.0.40
codegen_flags: <defaults>
</compile_context>

<pallas_src>
import jax
import jax.numpy as jnp
from jax.experimental import pallas as pl
from jax.experimental.pallas import tpu as pltpu


def _centre_kernel(c_ref, w_ref, b_ref, out_ref):
    # c_ref  : [T, 2]   f32  pre-summed, pre-masked (cx, cy); 0.5 folded into w
    # w_ref  : [2, Hp]  f32  (= 0.5 * W^T, zero-padded to Hp; resident)
    # b_ref  : [1, Hp]  f32  (zero-padded; resident)
    # out_ref: [T, Hp]
    c = c_ref[...]
    cx = c[:, 0:1]                       # [T, 1]
    cy = c[:, 1:2]                       # [T, 1]
    w = w_ref[...]                       # [2, Hp]
    # Linear(2, H) on the VPU: out[r, :] = cx[r]*w0 + cy[r]*w1 + bias.
    out = cx * w[0:1, :] + cy * w[1:2, :] + b_ref[...]
    out_ref[...] = out.astype(out_ref.dtype)


def _pick_row_tile(n_rows, h_pad, out_itemsize,
                   vmem_budget_bytes=16 * 1024 * 1024):
    """Rows per grid step, budgeting the PADDED double-buffered VMEM footprint.

    Per output row (padded layout):
      * output tile : h_pad * out_itemsize bytes
      * centers tile: 128 lanes * 4 bytes (the 2-wide lane axis pads to 128)
    Both are double-buffered by the BlockSpec pipeline (x2).  The resident
    weight/bias blocks (sublane-padded to 8 rows, also double-buffered) are
    subtracted from the budget as a fixed cost.
    """
    per_row = 2 * (h_pad * out_itemsize + 128 * 4)
    resident = 2 * 2 * (8 * h_pad * 4)                 # weight + bias blocks
    budget = max(vmem_budget_bytes - resident, 8 * per_row)
    t = max(8, (budget // per_row) // 8 * 8)           # sublane multiple of 8
    if t >= n_rows:
        # Whole output fits in one tile.  If it is big enough, still split it
        # into two even steps so ("parallel",) can use both TensorCores.
        if n_rows >= 16 and n_rows % 16 == 0:
            return n_rows // 2
        return n_rows
    return t


def centre_query_encoding(boxes, lengths, weight, bias, out_dtype=jnp.float32):
    """boxes: [B, ML, 4] f32, lengths: [B] int32, weight: [H, 2], bias: [H].

    Returns [ML, B, H], matching CentreQueryEncoding.forward (stack over dim 1).
    """
    B, ML, _ = boxes.shape
    H = weight.shape[0]
    N = ML * B
    Hp = ((H + 127) // 128) * 128

    # --- tiny wrapper-side prep (O(ML*B), noise next to O(ML*B*H) output) ---
    boxes_f = boxes.astype(jnp.float32)
    cx = boxes_f[..., 0] + boxes_f[..., 2]                       # [B, ML]
    cy = boxes_f[..., 1] + boxes_f[..., 3]                       # [B, ML]
    mask = (jnp.arange(ML, dtype=jnp.int32)[None, :]
            < lengths.astype(jnp.int32)[:, None]).astype(jnp.float32)
    cx = cx * mask                                               # padded rows -> 0
    cy = cy * mask                                               #  => output = bias
    # Row r = m*B + b  (ML-major), i.e. exactly the (ML, B, H) output layout.
    centers = jnp.stack([cx.T, cy.T], axis=-1).reshape(N, 2)     # [N, 2]

    # Fold the midpoint 0.5 into the weight; zero-pad H -> Hp (lane-dense out).
    w_half = (weight.T * 0.5).astype(jnp.float32)                # [2, H]
    w_pad = jnp.pad(w_half, ((0, 0), (0, Hp - H)))               # [2, Hp]
    b_pad = jnp.pad(bias.astype(jnp.float32).reshape(1, H),
                    ((0, 0), (0, Hp - H)))                       # [1, Hp]

    T = _pick_row_tile(N, Hp, jnp.dtype(out_dtype).itemsize)
    grid = (pl.cdiv(N, T),)

    out = pl.pallas_call(
        _centre_kernel,
        out_shape=jax.ShapeDtypeStruct((N, Hp), out_dtype),
        grid_spec=pltpu.PrefetchScalarGridSpec(
            num_scalar_prefetch=0,
            grid=grid,
            in_specs=[
                pl.BlockSpec((T, 2), lambda i: (i, 0)),      # centers row tile
                pl.BlockSpec((2, Hp), lambda i: (0, 0)),     # weight (resident)
                pl.BlockSpec((1, Hp), lambda i: (0, 0)),     # bias (resident)
            ],
            out_specs=pl.BlockSpec((T, Hp), lambda i: (i, 0)),
        ),
        compiler_params=pltpu.CompilerParams(
            dimension_semantics=("parallel",),
            vmem_limit_bytes=32 * 1024 * 1024),
    )(centers, w_pad, b_pad)

    # Free reshape (same contiguous layout); slicing off Hp padding is a no-op
    # when H is already a multiple of 128.
    return out[:, :H].reshape(ML, B, H)


def _reference(boxes, lengths, weight, bias):
    B, ML, _ = boxes.shape
    cx = (boxes[..., 0] + boxes[..., 2]) * 0.5
    cy = (boxes[..., 1] + boxes[..., 3]) * 0.5
    center = jnp.stack([cx, cy], axis=-1)                            # [B, ML, 2]
    mask = (jnp.arange(ML)[None, :] < lengths[:, None]).astype(jnp.float32)
    center = center * mask[..., None]
    feat = center @ weight.T + bias                                  # [B, ML, H]
    return jnp.transpose(feat, (1, 0, 2))                            # [ML, B, H]


if __name__ == "__main__":
    B, ML, H = 2, 8, 32        # batch=2, max boxes (seq)=8, hidden=32
    key = jax.random.PRNGKey(0)
    k_boxes, k_w, k_b = jax.random.split(key, 3)

    boxes = jax.random.uniform(k_boxes, (B, ML, 4), dtype=jnp.float32)
    lengths = jnp.array([5, 8], dtype=jnp.int32)   # per-batch number of real boxes
    weight = jax.random.normal(k_w, (H, 2), dtype=jnp.float32) * 0.1
    bias = jax.random.normal(k_b, (H,), dtype=jnp.float32) * 0.1

    out = centre_query_encoding(boxes, lengths, weight, bias)
    out = jax.block_until_ready(out)

    ref = _reference(boxes, lengths, weight, bias)
    assert out.shape == (ML, B, H)
    assert jnp.allclose(out, ref, atol=1e-5, rtol=1e-5)
    print("KERNEL_OK")
</pallas_src>

<mosaic_0001>
module attributes {stable_mosaic.version = 11 : i64} {
  func.func @_centre_kernel(%arg0: i32, %arg1: memref<8x2xf32, #tpu.memory_space<vmem>>, %arg2: memref<2x128xf32, #tpu.memory_space<vmem>>, %arg3: memref<1x128xf32, #tpu.memory_space<vmem>>, %arg4: memref<8x128xf32, #tpu.memory_space<vmem>>) attributes {dimension_semantics = [#tpu.dimension_semantics<parallel>], iteration_bounds = array<i64: 2>, scalar_prefetch = 0 : i64, scratch_operands = 0 : i64, tpu.core_type = #tpu.core_type<tc>, window_params = [{transform_indices = @transform_0, window_bounds = array<i64: 8, 2>}, {pipeline_mode = #tpu.pipeline_mode<synchronous>, transform_indices = @transform_1, window_bounds = array<i64: 2, 128>}, {pipeline_mode = #tpu.pipeline_mode<synchronous>, transform_indices = @transform_2, window_bounds = array<i64: 1, 128>}, {transform_indices = @transform_3, window_bounds = array<i64: 8, 128>}]} {
    %c0 = arith.constant 0 : index
    %c0_0 = arith.constant 0 : index
    %0 = vector.load %arg1[%c0, %c0_0] : memref<8x2xf32, #tpu.memory_space<vmem>>, vector<8x2xf32>
    %1 = vector.extract_strided_slice %0 {offsets = [0, 0], sizes = [8, 1], strides = [1, 1]} : vector<8x2xf32> to vector<8x1xf32>
    %2 = vector.extract_strided_slice %0 {offsets = [0, 1], sizes = [8, 1], strides = [1, 1]} : vector<8x2xf32> to vector<8x1xf32>
    %c0_1 = arith.constant 0 : index
    %c0_2 = arith.constant 0 : index
    %3 = vector.load %arg2[%c0_1, %c0_2] : memref<2x128xf32, #tpu.memory_space<vmem>>, vector<2x128xf32>
    %4 = vector.extract_strided_slice %3 {offsets = [0, 0], sizes = [1, 128], strides = [1, 1]} : vector<2x128xf32> to vector<1x128xf32>
    %5 = vector.broadcast %1 : vector<8x1xf32> to vector<8x128xf32>
    %6 = vector.broadcast %4 : vector<1x128xf32> to vector<8x128xf32>
    %7 = arith.mulf %5, %6 : vector<8x128xf32>
    %8 = vector.extract_strided_slice %3 {offsets = [1, 0], sizes = [1, 128], strides = [1, 1]} : vector<2x128xf32> to vector<1x128xf32>
    %9 = vector.broadcast %2 : vector<8x1xf32> to vector<8x128xf32>
    %10 = vector.broadcast %8 : vector<1x128xf32> to vector<8x128xf32>
    %11 = arith.mulf %9, %10 : vector<8x128xf32>
    %12 = arith.addf %7, %11 : vector<8x128xf32>
    %c0_3 = arith.constant 0 : index
    %c0_4 = arith.constant 0 : index
    %13 = vector.load %arg3[%c0_3, %c0_4] : memref<1x128xf32, #tpu.memory_space<vmem>>, vector<1x128xf32>
    %14 = vector.broadcast %13 : vector<1x128xf32> to vector<8x128xf32>
    %15 = arith.addf %12, %14 : vector<8x128xf32>
    %c0_5 = arith.constant 0 : index
    %c0_6 = arith.constant 0 : index
    %16 = vector.load %arg4[%c0_5, %c0_6] : memref<8x128xf32, #tpu.memory_space<vmem>>, vector<8x128xf32>
    tpu.vector_store %arg4[%c0_5, %c0_6], %15 {strides = array<i32>} : memref<8x128xf32, #tpu.memory_space<vmem>>, vector<8x128xf32>,
    return
  }
  func.func @transform_0(%arg0: i32) -> (i32, i32) {
    %c0_i32 = arith.constant 0 : i32
    %c0_i32_0 = arith.constant 0 : i32
    return %arg0, %c0_i32 : i32, i32
  }
  func.func @transform_1(%arg0: i32) -> (i32, i32) {
    %c0_i32 = arith.constant 0 : i32
    %c0_i32_0 = arith.constant 0 : i32
    %c0_i32_1 = arith.constant 0 : i32
    return %c0_i32, %c0_i32_0 : i32, i32
  }
  func.func @transform_2(%arg0: i32) -> (i32, i32) {
    %c0_i32 = arith.constant 0 : i32
    %c0_i32_0 = arith.constant 0 : i32
    %c0_i32_1 = arith.constant 0 : i32
    return %c0_i32, %c0_i32_0 : i32, i32
  }
  func.func @transform_3(%arg0: i32) -> (i32, i32) {
    %c0_i32 = arith.constant 0 : i32
    %c0_i32_0 = arith.constant 0 : i32
    return %arg0, %c0_i32 : i32, i32
  }
}

</mosaic_0001>

<bundles_post_ra>
// kernel: tpu_custom_call.1
= control target key start
LH: loop header
LB: loop body
LE: loop exit
PB: predicated region body
PF: predicated region fallthrough
CT: control target
= control target key end

     0   :  { %8 = vsyncpa [#allocation3], 0  ;;  %s517_s0 = inlined_call_operand.vmem [shape: f32[16,2], index: 0, kind: input, shape index: {}]   ;;  %s518_s1 = inlined_call_operand.vmem [shape: f32[2,128], index: 1, kind: input, shape index: {}]   ;;  %s519_s2 = inlined_call_operand.vmem [shape: f32[1,128], index: 2, kind: input, shape index: {}]   ;;  %s520_s3 = inlined_call_operand.hbm [shape: f32[16,128], index: 3, kind: output, shape index: {}]  }
   0x1   :  { %10 = vsyncpa [#allocation3 + $0x1], 0  ;;  %s411_s12 = smov 0   ;;  %s413_s13 = smov 0  }
   0x2   :  { %s415_s14 = smov 0   ;;  %s417_s15 = smov 0  }
   0x3 LB: > { %s432_s16 = sadd.s32 4294967295, %s386_s15   ;;  %s270_s17 = sadd.s32 4294967294, %s386_s15   ;;  %s386_s15 = sphi %s417_s15, %s526_s15   ;;  %s382_s14 = sphi %s415_s14, %s525_s14   ;;  %s378_s13 = sphi %s413_s13, %s524_s13   ;;  %s374_s12 = sphi %s411_s12, %s523_s12  }
   0x4   : > { %s436_s18 = sadd.s32 1, %s386_s15   ;;  %s91_s19 = sadd.s32 1, %s382_s14 }
   0x5   : > { %s88_s20 = ssub.s32 %s386_s15, %s436_s18  ;;  %p101_p0 = scmp.ne.s32.totalorder %s382_s14, %s378_s13 }
   0x6   : > { %p89_p1 = scmp.eq.s32.totalorder %s88_s20, 0  ;;  %p102_p2 = scmp.eq.s32.totalorder %s432_s16, 1 }
   0x7   : > { %p107_p3 = scmp.ne.s32.totalorder %s378_s13, %s374_s12  ;;  %p108_p4 = scmp.eq.s32.totalorder %s270_s17, 1 }
   0x8   : > { %s447_s21 = scalar_select %p89_p1, %s382_s14, %s91_s19  }
   0x9   : > { %p449_p5 = por %p102_p2, %p101_p0  ;;  %p453_p6 = por %p108_p4, %p107_p3 }
   0xa   : > { %p273_p7 = scmp.ge.s32.totalorder %s386_s15, 1  ;;  %p139_p8 = scmp.lt.s32.totalorder %s386_s15, 3 }
   0xc   : > { %p140_p9 = pnand %p273_p7, %p139_p8 }
   0xd   : > { %p162_p10 = scmp.lt.s32.totalorder (!%p140_p9), %s432_s16, 1  ;;  %v388_v0 = vmov (!%p140_p9), 0   ;;  %v389_v2 = vmov (!%p140_p9), 1   ;;  %v173_v3 = vlaneseq (!%p140_p9)  ;;  %s159_s29 = sand.u32 (!%p140_p9), 1, %s378_s13   ;;  %v167_v7 = vld [vmem:[%s518_s1] sm:$0x3] (!%p140_p9) }
   0xe   : > { %143 = sbr.rel (%p140_p9) target bundleno = 179 (0xb3), region = 32  ;;  %322 = vset.pattern.permute.xlu0 (!%p140_p9), %v388_v0  ;;  %s274_s5 = sshll.u32 (!%p140_p9), %s159_s29, 3  ;;  %v276_v14 = vld [vmem:[%s519_s2] ss:$0 sm:$0xff] (!%p140_p9) }
   0xf   : > { %v174_v4 = vshrl.u32 (!%p140_p9), %v173_v3, 7  ;;  %s278_s8 = sshll.u32 (!%p140_p9), %s432_s16, 7  ;;  %s161_s9 = scalar_lea.vmem (!%p140_p9), [#allocation2], %s274_s5 }
  0x10   : > { %s211_s10 = sshll.u32 (!%p140_p9), %s161_s9, 4  ;;  %s475_s19 = scalar_lea.hbm (!%p140_p9), %s520_s3, %s278_s8  ;;  %s477_s10 = int_to_ptr.vmem [resolvable:$true] %s211_s10 }
  0x11   : > { %v175_v5 = vsub.s32 (!%p140_p9), 0, %v174_v4  ;;  %v184_v6 = vsub.s32 (!%p140_p9), 1, %v174_v4  ;;  %s198_s20 = scalar_lea.sflag (!%p140_p9), [#allocation3], %s159_s29 }
  0x13   : > { %v176_v9 = vrot.slane (!%p140_p9), %v167_v7, %v175_v5  ;;  %v185_v10 = vrot.slane (!%p140_p9), %v167_v7, %v184_v6 }
  0x15   : > { %s163_s24 = scalar_select %p162_p10, %s432_s16, 1 }
  0x16   : > { %s390_s16 = smov [#allocation2]  }
  0x17   : > { %s275_s25 = sshll.u32 %s163_s24, 3  ;;  %s324_s24 = scalar_lea.vmem %s477_s10, 128 }
  0x18   : > { %s165_s28 = scalar_lea.vmem %s517_s0, %s275_s25  ;;  %p325_p11 = scmp.ne.s32.totalorder %s477_s10, %s324_s24 }
  0x19   : > { %v166_v1 = vld [vmem:[%s165_s28] sm:$0xff]  ;;  %s328_s25 = sshll.u32 %s390_s16, 4  ;;  %s329_s25 = int_to_ptr.vmem [resolvable:$false] %s328_s25 }
  0x1a   : > { %170 = vperm.xlu0 %322, %v166_v1   ;;  %p326_p12 = pnand %p325_p11, %p449_p5  ;;  %s330_s26 = scalar_lea.vmem %s329_s25, 256 }
  0x1b   : > { %p331_p0 = scmp.lt.s32.totalorder %s477_s10, %s329_s25  ;;  %p332_p1 = scmp.lt.s32.totalorder %s330_s26, %s324_s24 }
  0x1c   : > { %p327_p13 = pneg %p326_p12 }
  0x1d   : > { %p333_p2 = por %p332_p1, %p331_p0 }
  0x1e   : > { %323 = vset.pattern.permute.xlu0 %v389_v2 }
  0x1f   : > { %179 = vperm.xlu0 %323, %v166_v1   ;;  %p334_p3 = pnand %p333_p2, %p327_p13 }
  0x99   : > { %v171_v8 = vpop.permute.xlu0 %170 }
  0x9a   : > { %v177_v12 = vmul.f32 %v176_v9, %v171_v8 }
  0x9e   : > { %v180_v11 = vpop.permute.xlu0 %179 }
  0x9f   : > { %v186_v13 = vmul.f32 %v185_v10, %v180_v11 }
  0xa1   : > { %v187_v15 = vadd.f32 %v186_v13, %v177_v12 }
  0xa3   : > { %v195_v16 = vadd.f32 %v276_v14, %v187_v15 }
  0xa5   : > { %196 = vst [vmem:[%s161_s9] sm:$0xff] %v195_v16 }
  0xa6   : > { %337 = shalt.err (!%p334_p3)
}
  0xa7   : > { %s338_s27 = scalar_lea.hbm %s475_s19, 128  ;;  %s342_s30 = scalar_lea.hbm %s520_s3, 256 }
  0xa8   : > { %p339_p4 = scmp.ne.s32.totalorder %s475_s19, %s338_s27  ;;  %p343_p9 = scmp.lt.u32.totalorder %s475_s19, %s520_s3 }
  0xa9   : > { %p344_p10 = scmp.lt.u32.totalorder %s342_s30, %s338_s27  ;;  %p346_p12 = scmp.lt.u32.totalorder %s338_s27, %s475_s19 }
  0xaa   : > { %p340_p7 = pnand %p339_p4, %p449_p5 }
  0xab   : > { %p345_p11 = por %p344_p10, %p343_p9 }
  0xac   : > { %p341_p8 = pneg %p340_p7 }
  0xad   : > { %p347_p13 = por %p346_p12, %p345_p11 }
  0xaf   : > { %p348_p0 = pnand %p347_p13, %p341_p8 }
  0xb1   : > { %351 = shalt.err (!%p348_p0)
}
  0xb2   : > { %281 = dma.vmem_to_hbm [thread:$0]  (%p449_p5), %s477_s10, 128, %s475_s19, %s198_s20  }
  0xb3 PF: > { %p287_p1 = scmp.ge.s32.totalorder %s386_s15, 2  ;;  %s223_s6 = sand.u32 1, %s374_s12  }
  0xb4   : > { %s224_s7 = scalar_lea.sflag [#allocation3], %s223_s6 }
  0xb5   : > { %p284_p2 = pnand %p287_p1, %p453_p6 }
  0xb7   : > { %369 = dma.done.wait (!%p284_p2), %s224_s7, 128  }
  0xb8   : > { %371 = vsyncadd (!%p284_p2), %s224_s7, 4294967168  ;;  %p13_p3 = scmp.ge.s32.totalorder %s436_s18, 4   ;;  %s523_s12 = smov %s378_s13 }
  0xb9   : > { %s524_s13 = smov %s382_s14  ;;  %s525_s14 = smov %s447_s21 }
  0xba   : > { %s526_s15 = smov %s436_s18  ;;  %15 = sbr.rel (!%p13_p3) target bundleno = 3 (0x3), region = 67 }
  0xc1   :  { %229 = vsyncpa [#allocation3], 1 }
  0xc2   :  { %231 = vsyncpa [#allocation3 + $0x1], 1 }

</bundles_post_ra>
